<compile_context>
chip_gen: v7x
topology: tpu7x:2x2x1
jax: 0.10.0
libtpu: 0.0.40
codegen_flags: <defaults>
</compile_context>

<pallas_src>
import functools

import jax
import jax.numpy as jnp
from jax.experimental import pallas as pl
from jax.experimental.pallas import tpu as pltpu


# ---------------------------------------------------------------------------
# Small helpers
# ---------------------------------------------------------------------------

def _round_up(v, m):
    return ((v + m - 1) // m) * m


def _vmem_capacity_bytes():
    """Physical VMEM per TensorCore; conservative (v7x-sized) fallback."""
    try:
        return int(pltpu.get_tpu_info().vmem_capacity_bytes)
    except Exception:
        return 64 << 20


def _vmem_plan(vmem_budget_bytes):
    """Return (budget for explicit tiles, scoped limit handed to Mosaic)."""
    cap = _vmem_capacity_bytes()
    limit = max(32 << 20, min(cap - (2 << 20), int(cap * 0.75)))
    if vmem_budget_bytes is None:
        budget = int(limit * 0.8)          # headroom for compiler-internal scratch
    else:
        budget = int(vmem_budget_bytes)
        limit = max(limit, min(cap - (2 << 20), budget + (8 << 20)))
    return budget, limit


def _pick_row_tile(M, tm):
    """Largest valid row tile <= tm: full M if M is small, else a multiple of 8."""
    if M <= tm:
        return M
    return max(8, (tm // 8) * 8)


# ---------------------------------------------------------------------------
# Kernels
# ---------------------------------------------------------------------------

def _layernorm_rows(x_ref, g_ref, b_ref, *, eps):
    """LayerNorm over the last dim of a (rows, D) tile; math in f32.

    Single-pass statistics (E[x], E[x^2]) and fused scale/shift so the final
    elementwise pass over the tile is a single multiply-add.
    """
    x = x_ref[...].astype(jnp.float32)
    inv_d = 1.0 / x.shape[-1]
    mean = jnp.sum(x, axis=-1, keepdims=True) * inv_d
    mean_sq = jnp.sum(x * x, axis=-1, keepdims=True) * inv_d
    var = mean_sq - mean * mean
    inv = jax.lax.rsqrt(var + eps)                          # EUP slot
    scale = inv * g_ref[...].astype(jnp.float32)            # (rows, D)
    shift = b_ref[...].astype(jnp.float32) - mean * scale   # (rows, D)
    return x * scale + shift


def _layernorm_kernel(x_ref, g_ref, b_ref, o_ref, *, eps):
    o_ref[...] = _layernorm_rows(x_ref, g_ref, b_ref, eps=eps).astype(o_ref.dtype)


def _prenorm_linear_kernel(x_ref, g_ref, b_ref, w_ref, bias_ref, o_ref, xn_ref,
                           *, eps):
    # Compute LayerNorm once per row tile (j == 0) and cache it (input dtype)
    # in VMEM scratch; every output-column tile reuses it.
    @pl.when(pl.program_id(1) == 0)
    def _():
        xn_ref[...] = _layernorm_rows(x_ref, g_ref, b_ref, eps=eps).astype(
            xn_ref.dtype)

    # MXU-native feed: (tm, D) @ (D, tn) contracts on the RHS sublane axis,
    # output-column axis stays lane-dense; f32 accumulation.
    acc = jnp.dot(xn_ref[...], w_ref[...], preferred_element_type=jnp.float32)
    o_ref[...] = (acc + bias_ref[...].astype(jnp.float32)).astype(o_ref.dtype)


# ---------------------------------------------------------------------------
# Wrappers
# ---------------------------------------------------------------------------

def layer_norm(x, gamma, beta, *, eps=1e-5, tm=1024, vmem_budget_bytes=None):
    """Pallas LayerNorm over the last dim (the `norm` half of PreNorm)."""
    *lead, D = x.shape
    M = 1
    for s in lead:
        M *= s
    x2 = x.reshape(M, D)
    g2 = gamma.reshape(1, D)
    b2 = beta.reshape(1, D)

    budget, vmem_limit = _vmem_plan(vmem_budget_bytes)
    isz = x.dtype.itemsize

    def _vmem(tm_):
        # in + out double-buffered tiles + f32 intermediates (x, scale, shift).
        return 4 * tm_ * D * isz + 3 * tm_ * D * 4 + 4 * D * 4

    tm_eff = _pick_row_tile(M, tm)
    while _vmem(tm_eff) > budget and tm_eff >= 16 and tm_eff % 16 == 0:
        tm_eff //= 2

    grid = (pl.cdiv(M, tm_eff),)

    out = pl.pallas_call(
        functools.partial(_layernorm_kernel, eps=eps),
        out_shape=jax.ShapeDtypeStruct((M, D), x.dtype),
        grid_spec=pltpu.PrefetchScalarGridSpec(
            num_scalar_prefetch=0,
            grid=grid,
            in_specs=[
                pl.BlockSpec((tm_eff, D), lambda i: (i, 0)),   # x row tile
                pl.BlockSpec((1, D), lambda i: (0, 0)),        # gamma
                pl.BlockSpec((1, D), lambda i: (0, 0)),        # beta
            ],
            out_specs=pl.BlockSpec((tm_eff, D), lambda i: (i, 0)),
        ),
        compiler_params=pltpu.CompilerParams(
            dimension_semantics=("parallel",),
            vmem_limit_bytes=vmem_limit),
        cost_estimate=pl.CostEstimate(
            flops=7 * M * D,
            transcendentals=M,
            bytes_accessed=2 * M * D * isz + 2 * D * 4),
    )(x2, g2, b2)
    return out.reshape(*lead, D)


def prepare_linear_params(w, b):
    """Pad N up to a lane multiple and transpose to the MXU-native (D, N) layout.

    In real use call this once at parameter-init time; `pre_norm_linear`
    accepts the raw PyTorch (N, D)/(N,) params and prepares them on the fly
    (constant-folded under jit with constant params).
    """
    N, D = w.shape
    N_pad = max(128, _round_up(N, 128))
    if N_pad != N:
        w = jnp.pad(w, ((0, N_pad - N), (0, 0)))
        b = jnp.pad(b, (0, N_pad - N))
    return w.T, b.reshape(1, N_pad), N          # (D, N_pad), (1, N_pad), N


def pre_norm_linear(x, gamma, beta, w, b, *, eps=1e-5, tm=512, tn=512,
                    vmem_budget_bytes=None):
    """Fused PreNorm(LayerNorm(D), fn=Linear(D, N)): LayerNorm(x) @ w.T + b.

    `w` is the PyTorch Linear weight of shape (N, D); `b` has shape (N,).
    Note: the normalized activations are cast back to the input dtype before
    the MXU matmul (f32 norm math, f32 accumulation) — matches common practice.
    """
    *lead, D = x.shape
    M = 1
    for s in lead:
        M *= s
    x2 = x.reshape(M, D)
    g2 = gamma.reshape(1, D)
    be2 = beta.reshape(1, D)
    wT, b2, N = prepare_linear_params(w, b)      # (D, N_pad) lane-dense weight
    N_pad = wT.shape[1]

    budget, vmem_limit = _vmem_plan(vmem_budget_bytes)
    x_isz = x.dtype.itemsize
    w_isz = wT.dtype.itemsize

    tm_eff = _pick_row_tile(M, tm)
    tn_eff = max(min((tn // 128) * 128, N_pad), 128)

    def _vmem(tm_, tn_):
        tiles = (2 * tm_ * D * x_isz            # x tile (double-buffered)
                 + 2 * D * tn_ * w_isz          # weight tile
                 + 2 * tm_ * tn_ * x_isz        # output tile
                 + tm_ * D * x_isz)             # cached LayerNorm(x) scratch
        f32_tmp = 3 * tm_ * D * 4 + tm_ * tn_ * 4   # norm temps + f32 matmul acc
        small = 2 * (2 * D + tn_) * 4
        return tiles + f32_tmp + small

    # TODO(synk): for very large D (>= ~4096) on v7x, add a K (D) grid axis with
    # an f32 VMEM accumulator instead of shrinking tm below the MXU width.
    while _vmem(tm_eff, tn_eff) > budget and tm_eff > 128 and tm_eff % 16 == 0:
        tm_eff //= 2
    while _vmem(tm_eff, tn_eff) > budget and tn_eff % 256 == 0:
        tn_eff //= 2
    while _vmem(tm_eff, tn_eff) > budget and tm_eff > 16 and tm_eff % 16 == 0:
        tm_eff //= 2

    n_row_tiles = pl.cdiv(M, tm_eff)
    grid = (n_row_tiles, pl.cdiv(N_pad, tn_eff))

    out = pl.pallas_call(
        functools.partial(_prenorm_linear_kernel, eps=eps),
        out_shape=jax.ShapeDtypeStruct((M, N_pad), x.dtype),
        grid_spec=pltpu.PrefetchScalarGridSpec(
            num_scalar_prefetch=0,
            grid=grid,
            in_specs=[
                pl.BlockSpec((tm_eff, D), lambda i, j: (i, 0)),    # x row tile
                pl.BlockSpec((1, D), lambda i, j: (0, 0)),         # gamma
                pl.BlockSpec((1, D), lambda i, j: (0, 0)),         # beta
                pl.BlockSpec((D, tn_eff), lambda i, j: (0, j)),    # weight (D,tn)
                pl.BlockSpec((1, tn_eff), lambda i, j: (0, j)),    # bias tile
            ],
            out_specs=pl.BlockSpec((tm_eff, tn_eff), lambda i, j: (i, j)),
            scratch_shapes=[pltpu.VMEM((tm_eff, D), x.dtype)],     # cached xn
        ),
        compiler_params=pltpu.CompilerParams(
            dimension_semantics=("parallel", "arbitrary"),
            vmem_limit_bytes=vmem_limit),
        cost_estimate=pl.CostEstimate(
            flops=2 * M * N_pad * D + 7 * M * D,
            transcendentals=M,
            bytes_accessed=(M * D * x_isz
                            + n_row_tiles * N_pad * D * w_isz   # weight re-reads
                            + M * N_pad * x_isz
                            + (2 * D + N_pad) * 4)),
    )(x2, g2, be2, wT, b2)

    if N_pad != N:
        out = out[:, :N]
    return out.reshape(*lead, N)


class PreNorm:
    """PreNorm(norm_class=LayerNorm, dim, fn): x -> fn(norm(x), **kwargs).

    The LayerNorm runs as a Pallas kernel; `fn` is an arbitrary user callable
    (exactly as in the PyTorch module) and runs as plain JAX afterwards.  For
    the common Reformer case where `fn` is a Linear layer, use
    `pre_norm_linear` for the fully fused single-kernel path.
    """
    # TODO(synk): a generic `fn` callable has no Pallas equivalent; only the
    # LayerNorm (and the fused fn=Linear case) execute inside the kernel.

    def __init__(self, gamma, beta, fn, *, eps=1e-5):
        self.gamma = gamma
        self.beta = beta
        self.fn = fn
        self.eps = eps

    def __call__(self, x, **kwargs):
        return self.fn(layer_norm(x, self.gamma, self.beta, eps=self.eps),
                       **kwargs)


if __name__ == "__main__":
    key = jax.random.PRNGKey(0)
    kx, kg, kb, kw, kbias = jax.random.split(key, 5)

    B, T, D, N = 2, 8, 32, 48   # seq=8, hidden=32, fn = Linear(32 -> 48)
    eps = 1e-5

    x = jax.random.normal(kx, (B, T, D), dtype=jnp.float32)
    gamma = 1.0 + 0.1 * jax.random.normal(kg, (D,), dtype=jnp.float32)
    beta = 0.1 * jax.random.normal(kb, (D,), dtype=jnp.float32)
    w = jax.random.normal(kw, (N, D), dtype=jnp.float32) / jnp.sqrt(D)
    b = 0.1 * jax.random.normal(kbias, (N,), dtype=jnp.float32)

    # Pure-JAX reference (mirrors nn.LayerNorm followed by fn).
    def ln_ref(v):
        mu = jnp.mean(v, axis=-1, keepdims=True)
        var = jnp.mean((v - mu) ** 2, axis=-1, keepdims=True)
        return (v - mu) / jnp.sqrt(var + eps) * gamma + beta

    # 1) Fused path: PreNorm(LayerNorm, D, fn=Linear(D, N)).
    out = pre_norm_linear(x, gamma, beta, w, b, eps=eps)
    out = jax.block_until_ready(out)
    ref = ln_ref(x) @ w.T + b
    assert out.shape == (B, T, N)
    assert jnp.allclose(out, ref, atol=1e-4, rtol=1e-4)

    # 2) Generic-fn path: Pallas LayerNorm, arbitrary fn (GELU) applied after.
    pre = PreNorm(gamma, beta, fn=jax.nn.gelu, eps=eps)
    out2 = jax.block_until_ready(pre(x))
    ref2 = jax.nn.gelu(ln_ref(x))
    assert out2.shape == (B, T, D)
    assert jnp.allclose(out2, ref2, atol=1e-4, rtol=1e-4)

    print("KERNEL_OK")
</pallas_src>

<mosaic_0001>
module attributes {stable_mosaic.version = 11 : i64} {
  func.func @_prenorm_linear_kernel(%arg0: i32, %arg1: i32, %arg2: memref<16x32xf32, #tpu.memory_space<vmem>>, %arg3: memref<1x32xf32, #tpu.memory_space<vmem>>, %arg4: memref<1x32xf32, #tpu.memory_space<vmem>>, %arg5: memref<32x128xf32, #tpu.memory_space<vmem>>, %arg6: memref<1x128xf32, #tpu.memory_space<vmem>>, %arg7: memref<16x128xf32, #tpu.memory_space<vmem>>, %arg8: memref<16x32xf32, #tpu.memory_space<vmem>>) attributes {dimension_semantics = [#tpu.dimension_semantics<parallel>, #tpu.dimension_semantics<arbitrary>], iteration_bounds = array<i64: 1, 1>, scalar_prefetch = 0 : i64, scratch_operands = 1 : i64, tpu.core_type = #tpu.core_type<tc>, window_params = [{transform_indices = @transform_0, window_bounds = array<i64: 16, 32>}, {pipeline_mode = #tpu.pipeline_mode<synchronous>, transform_indices = @transform_1, window_bounds = array<i64: 1, 32>}, {pipeline_mode = #tpu.pipeline_mode<synchronous>, transform_indices = @transform_2, window_bounds = array<i64: 1, 32>}, {transform_indices = @transform_3, window_bounds = array<i64: 32, 128>}, {transform_indices = @transform_4, window_bounds = array<i64: 1, 128>}, {transform_indices = @transform_5, window_bounds = array<i64: 16, 128>}]} {
    %c0_i32 = arith.constant 0 : i32
    %0 = arith.cmpi eq, %arg1, %c0_i32 : i32
    %1 = arith.extui %0 : i1 to i32
    %c0_i32_0 = arith.constant 0 : i32
    %2 = arith.cmpi ne, %1, %c0_i32_0 : i32
    scf.if %2 {
      %c0_8 = arith.constant 0 : index
      %c0_9 = arith.constant 0 : index
      %10 = vector.load %arg2[%c0_8, %c0_9] : memref<16x32xf32, #tpu.memory_space<vmem>>, vector<16x32xf32>
      %cst_10 = arith.constant dense<0.000000e+00> : vector<16xf32>
      %11 = vector.multi_reduction <add>, %10, %cst_10 [1] : vector<16x32xf32> to vector<16xf32>
      %12 = vector.shape_cast %11 : vector<16xf32> to vector<16x1xf32>
      %cst_11 = arith.constant 3.125000e-02 : f32
      %13 = vector.broadcast %cst_11 : f32 to vector<16x1xf32>
      %14 = arith.mulf %12, %13 : vector<16x1xf32>
      %15 = arith.mulf %10, %10 : vector<16x32xf32>
      %cst_12 = arith.constant dense<0.000000e+00> : vector<16xf32>
      %16 = vector.multi_reduction <add>, %15, %cst_12 [1] : vector<16x32xf32> to vector<16xf32>
      %17 = vector.shape_cast %16 : vector<16xf32> to vector<16x1xf32>
      %cst_13 = arith.constant 3.125000e-02 : f32
      %18 = vector.broadcast %cst_13 : f32 to vector<16x1xf32>
      %19 = arith.mulf %17, %18 : vector<16x1xf32>
      %20 = arith.mulf %14, %14 : vector<16x1xf32>
      %21 = arith.subf %19, %20 : vector<16x1xf32>
      %cst_14 = arith.constant 9.99999974E-6 : f32
      %22 = vector.broadcast %cst_14 : f32 to vector<16x1xf32>
      %23 = arith.addf %21, %22 : vector<16x1xf32>
      %24 = math.rsqrt %23 : vector<16x1xf32>
      %c0_15 = arith.constant 0 : index
      %c0_16 = arith.constant 0 : index
      %25 = vector.load %arg3[%c0_15, %c0_16] : memref<1x32xf32, #tpu.memory_space<vmem>>, vector<1x32xf32>
      %26 = vector.broadcast %24 : vector<16x1xf32> to vector<16x32xf32>
      %27 = vector.broadcast %25 : vector<1x32xf32> to vector<16x32xf32>
      %28 = arith.mulf %26, %27 : vector<16x32xf32>
      %c0_17 = arith.constant 0 : index
      %c0_18 = arith.constant 0 : index
      %29 = vector.load %arg4[%c0_17, %c0_18] : memref<1x32xf32, #tpu.memory_space<vmem>>, vector<1x32xf32>
      %30 = vector.broadcast %14 : vector<16x1xf32> to vector<16x32xf32>
      %31 = arith.mulf %30, %28 : vector<16x32xf32>
      %32 = vector.broadcast %29 : vector<1x32xf32> to vector<16x32xf32>
      %33 = arith.subf %32, %31 : vector<16x32xf32>
      %34 = arith.mulf %10, %28 : vector<16x32xf32>
      %35 = arith.addf %34, %33 : vector<16x32xf32>
      %c0_19 = arith.constant 0 : index
      %c0_20 = arith.constant 0 : index
      %36 = vector.load %arg8[%c0_19, %c0_20] : memref<16x32xf32, #tpu.memory_space<vmem>>, vector<16x32xf32>
      tpu.vector_store %arg8[%c0_19, %c0_20], %35 {strides = array<i32>} : memref<16x32xf32, #tpu.memory_space<vmem>>, vector<16x32xf32>,
    } else {
    }
    %c0 = arith.constant 0 : index
    %c0_1 = arith.constant 0 : index
    %3 = vector.load %arg8[%c0, %c0_1] : memref<16x32xf32, #tpu.memory_space<vmem>>, vector<16x32xf32>
    %c0_2 = arith.constant 0 : index
    %c0_3 = arith.constant 0 : index
    %4 = vector.load %arg5[%c0_2, %c0_3] : memref<32x128xf32, #tpu.memory_space<vmem>>, vector<32x128xf32>
    %cst = arith.constant dense<0.000000e+00> : vector<16x128xf32>
    %5 = tpu.matmul %3, %4, %cst {dimension_numbers = #tpu.dot_dimension_numbers<[1], [0], [0], [1], [0, 0, 1, 1], [], []>} : vector<16x32xf32>, vector<32x128xf32>, vector<16x128xf32> -> vector<16x128xf32>
    %c0_4 = arith.constant 0 : index
    %c0_5 = arith.constant 0 : index
    %6 = vector.load %arg6[%c0_4, %c0_5] : memref<1x128xf32, #tpu.memory_space<vmem>>, vector<1x128xf32>
    %7 = vector.broadcast %6 : vector<1x128xf32> to vector<16x128xf32>
    %8 = arith.addf %5, %7 : vector<16x128xf32>
    %c0_6 = arith.constant 0 : index
    %c0_7 = arith.constant 0 : index
    %9 = vector.load %arg7[%c0_6, %c0_7] : memref<16x128xf32, #tpu.memory_space<vmem>>, vector<16x128xf32>
    tpu.vector_store %arg7[%c0_6, %c0_7], %8 {strides = array<i32>} : memref<16x128xf32, #tpu.memory_space<vmem>>, vector<16x128xf32>,
    return
  }
  func.func @transform_0(%arg0: i32, %arg1: i32) -> (i32, i32) {
    %c0_i32 = arith.constant 0 : i32
    %c0_i32_0 = arith.constant 0 : i32
    return %arg0, %c0_i32 : i32, i32
  }
  func.func @transform_1(%arg0: i32, %arg1: i32) -> (i32, i32) {
    %c0_i32 = arith.constant 0 : i32
    %c0_i32_0 = arith.constant 0 : i32
    %c0_i32_1 = arith.constant 0 : i32
    return %c0_i32, %c0_i32_0 : i32, i32
  }
  func.func @transform_2(%arg0: i32, %arg1: i32) -> (i32, i32) {
    %c0_i32 = arith.constant 0 : i32
    %c0_i32_0 = arith.constant 0 : i32
    %c0_i32_1 = arith.constant 0 : i32
    return %c0_i32, %c0_i32_0 : i32, i32
  }
  func.func @transform_3(%arg0: i32, %arg1: i32) -> (i32, i32) {
    %c0_i32 = arith.constant 0 : i32
    %c0_i32_0 = arith.constant 0 : i32
    return %c0_i32, %arg1 : i32, i32
  }
  func.func @transform_4(%arg0: i32, %arg1: i32) -> (i32, i32) {
    %c0_i32 = arith.constant 0 : i32
    %c0_i32_0 = arith.constant 0 : i32
    return %c0_i32, %arg1 : i32, i32
  }
  func.func @transform_5(%arg0: i32, %arg1: i32) -> (i32, i32) {
    %c0_i32 = arith.constant 0 : i32
    return %arg0, %arg1 : i32, i32
  }
}

</mosaic_0001>

<bundles_post_ra>
// kernel: tpu_custom_call.1
= control target key start
LH: loop header
LB: loop body
LE: loop exit
PB: predicated region body
PF: predicated region fallthrough
CT: control target
= control target key end

     0   :  { %10 = vsyncpa [#allocation4], 0  ;;  %s431_s0 = inlined_call_operand.hbm [shape: f32[16,32], index: 0, kind: input, shape index: {}]   ;;  %s432_s1 = inlined_call_operand.vmem [shape: f32[1,32], index: 1, kind: input, shape index: {}]   ;;  %s433_s2 = inlined_call_operand.vmem [shape: f32[1,32], index: 2, kind: input, shape index: {}]   ;;  %s434_s3 = inlined_call_operand.hbm [shape: f32[32,128], index: 3, kind: input, shape index: {}]   ;;  %s435_s4 = inlined_call_operand.vmem [shape: f32[1,128], index: 4, kind: input, shape index: {}]   ;;  %s436_s5 = inlined_call_operand.hbm [shape: f32[16,128], index: 5, kind: output, shape index: {}]  }
   0x1   :  { %11 = vsyncpa [#allocation7], 0 }
   0x2   :  { %12 = vsyncpa [#allocation5], 0  ;;  %s334_s18 = smov [#allocation3]   ;;  %s262_s22 = scalar_lea.hbm %s431_s0, 256 }
   0x3   :  { %s18_s19 = sshll.u32 %s334_s18, 4  ;;  %p263_p0 = scmp.ne.s32.totalorder %s431_s0, %s262_s22  ;;  %s19_s19 = int_to_ptr.vmem [resolvable:$true] %s18_s19 }
   0x4   :  { %p266_p1 = scmp.lt.u32.totalorder %s262_s22, %s431_s0 }
   0x6   :  { %p268_p2 = pnand %p266_p1, %p263_p0 }
   0x8   :  { %271 = shalt.err (!%p268_p2)
}
   0x9   :  { %s272_s27 = scalar_lea.vmem %s19_s19, 256  ;;  %p277_p4 = scmp.lt.s32.totalorder %s19_s19, %s19_s19 }
   0xa   :  { %p273_p3 = scmp.ne.s32.totalorder %s19_s19, %s272_s27  ;;  %p278_p5 = scmp.lt.s32.totalorder %s272_s27, %s272_s27 }
   0xc   :  { %p279_p6 = por %p278_p5, %p277_p4 }
   0xe   :  { %p280_p7 = pnand %p279_p6, %p273_p3 }
  0x10   :  { %283 = shalt.err (!%p280_p7)
}
  0x11   :  { %s335_s28 = smov 128   ;;  %s336_s29 = smov 8  }
  0x12   :  { %24 = dma.hbm_to_vmem [thread:$0]  %s431_s0, 256, %s19_s19, [#allocation4], %s335_s28, %s335_s28, %s336_s29  }
  0x13   :  { %s337_s7 = smov [#allocation6]   ;;  %s284_s11 = scalar_lea.hbm %s434_s3, 512 }
  0x14   :  { %s34_s8 = sshll.u32 %s337_s7, 4  ;;  %p285_p8 = scmp.ne.s32.totalorder %s434_s3, %s284_s11  ;;  %s35_s8 = int_to_ptr.vmem [resolvable:$true] %s34_s8 }
  0x15   :  { %p288_p9 = scmp.lt.u32.totalorder %s284_s11, %s434_s3 }
  0x17   :  { %p290_p10 = pnand %p288_p9, %p285_p8 }
  0x19   :  { %293 = shalt.err (!%p290_p10)
}
  0x1a   :  { %s294_s16 = scalar_lea.vmem %s35_s8, 512  ;;  %p299_p12 = scmp.lt.s32.totalorder %s35_s8, %s35_s8 }
  0x1b   :  { %p295_p11 = scmp.ne.s32.totalorder %s35_s8, %s294_s16  ;;  %p300_p13 = scmp.lt.s32.totalorder %s294_s16, %s294_s16 }
  0x1d   :  { %p301_p0 = por %p300_p13, %p299_p12 }
  0x1f   :  { %p302_p1 = pnand %p301_p0, %p295_p11 }
  0x21   :  { %305 = shalt.err (!%p302_p1)
}
  0x22   :  { %40 = dma.hbm_to_vmem [thread:$0]  %s434_s3, 512, %s35_s8, [#allocation7], %s335_s28, %s335_s28, %s336_s29  }
  0x23   :  { %328 = dma.done.wait [#allocation4], 256  }
  0x24   :  { %329 = vsyncadd [#allocation4], 4294967040 }
  0x25   :  { %330 = dma.done.wait [#allocation7], 512  }
  0x26   :  { %331 = vsyncadd [#allocation7], 4294966784  ;;  %vm55_vm0 = vcmask 261120   ;;  %v53_v0 = vld [vmem:[#allocation3] sm:$0xff]  ;;  %v54_v1 = vld [vmem:[#allocation3 + $0x8] sm:$0xff]  ;;  %s338_s21 = smov [#allocation8]  }
  0x27   :  { %v56_v2 = vsel %vm55_vm0, %v53_v0, 0.0  ;;  %v64_v3 = vmul.f32 %v53_v0, %v53_v0  ;;  %v65_v4 = vmul.f32 %v54_v1, %v54_v1  ;;  %v59_v6 = vsel %vm55_vm0, %v54_v1, 0.0  ;;  %v110_v8 = vld [vmem:[#allocation6] sm:$0xff]  ;;  %v111_v9 = vld [vmem:[#allocation6 + $0x8] sm:$0xff]  ;;  %v112_v11 = vld [vmem:[#allocation6 + $0x10] sm:$0xff]  ;;  %s210_s22 = sshll.u32 %s338_s21, 4  ;;  %s211_s22 = int_to_ptr.vmem [resolvable:$true] %s210_s22 }
  0x28   :  { %57 = vadd.xlane.f32.xlu0 %v56_v2  ;;  %v245_v10 = vpack.c.bf16 %v111_v9, %v110_v8  ;;  %v113_v12 = vld [vmem:[#allocation6 + $0x18] sm:$0xff]  ;;  %v223_v28 = vld [vmem:[%s432_s1] ss:$0 sm:$0xff]  ;;  %s306_s23 = scalar_lea.vmem %s211_s22, 256  ;;  %p311_p3 = scmp.lt.s32.totalorder %s211_s22, %s211_s22 }
  0x29   :  { %v66_v5 = vsel %vm55_vm0, %v64_v3, 0.0  ;;  %v69_v7 = vsel %vm55_vm0, %v65_v4, 0.0  ;;  %v249_v13 = vpack.c.bf16 %v113_v12, %v112_v11  ;;  %v224_v31 = vld [vmem:[%s433_s2] ss:$0 sm:$0xff]  ;;  %p307_p2 = scmp.ne.s32.totalorder %s211_s22, %s306_s23  ;;  %p312_p4 = scmp.lt.s32.totalorder %s306_s23, %s306_s23 }
  0x2a   :  { %67 = vadd.xlane.f32.xlu1 %v66_v5  ;;  %246 = vmatprep.subr.bf16.mxu0 %v245_v10  ;;  %v225_v44 = vld [vmem:[%s435_s4] ss:$0 sm:$0xff] }
  0x2b   :  { %248 = vmatpush3.bf16.msra.mxu0 %v245_v10  ;;  %p313_p5 = por %p312_p4, %p311_p3 }
  0x2c   :  { %60 = vadd.xlane.f32.xlu0 %v59_v6  ;;  %250 = vmatprep.subr.bf16.mxu0 %v249_v13 }
  0x2d   :  { %p314_p6 = pnand %p313_p5, %p307_p2 }
  0x2e   :  { %70 = vadd.xlane.f32.xlu1 %v69_v7 }
  0x2f   :  { %252 = vmatpush3.bf16.msra.mxu0 %v249_v13 }
  0xb5   :  { %v58_v14 = vpop.xlane.xlu0 %57 }
  0xb6   :  { %v62_v15 = vmul.f32 0.03125, %v58_v14 }
  0xb7   :  { %v68_v16 = vpop.xlane.xlu1 %67 }
  0xb8   :  { %v74_v17 = vmul.f32 %v62_v15, %v62_v15  ;;  %v72_v18 = vmul.f32 0.03125, %v68_v16 }
  0xb9   :  { %v61_v19 = vpop.xlane.xlu0 %60 }
  0xba   :  { %v76_v20 = vsub.f32 %v72_v18, %v74_v17  ;;  %v63_v21 = vmul.f32 0.03125, %v61_v19 }
  0xbb   :  { %v71_v22 = vpop.xlane.xlu1 %70 }
  0xbc   :  { %v78_v23 = vadd.f32 1e-05, %v76_v20  ;;  %v75_v24 = vmul.f32 %v63_v21, %v63_v21  ;;  %v73_v25 = vmul.f32 0.03125, %v71_v22 }
  0xbe   :  { %258 = vrsqrt.f32 %v78_v23  ;;  %v77_v26 = vsub.f32 %v73_v25, %v75_v24 }
  0xc0   :  { %v79_v27 = vadd.f32 1e-05, %v77_v26 }
  0xc2   :  { %260 = vrsqrt.f32 %v79_v27 }
  0xc8   :  { %v259_v29 = vpop.eup %258 }
  0xc9   :  { %v89_v30 = vmul.f32 %v259_v29, %v223_v28 }
  0xcb   :  { %v92_v32 = vmul.f32 %v89_v30, %v62_v15  ;;  %v102_v35 = vmul.f32 %v89_v30, %v53_v0 }
  0xcc   :  { %v261_v33 = vpop.eup %260 }
  0xcd   :  { %v100_v34 = vsub.f32 %v224_v31, %v92_v32  ;;  %v90_v36 = vmul.f32 %v261_v33, %v223_v28 }
  0xcf   :  { %v104_v37 = vadd.f32 %v102_v35, %v100_v34  ;;  %v93_v38 = vmul.f32 %v90_v36, %v63_v21  ;;  %v103_v40 = vmul.f32 %v90_v36, %v54_v1 }
  0xd1   :  { %106 = vst.msk [vmem:[#allocation2] sm:$0xff] %vm55_vm0, %v104_v37  ;;  %v101_v39 = vsub.f32 %v224_v31, %v93_v38 }
  0xd3   :  { %v105_v41 = vadd.f32 %v103_v40, %v101_v39 }
  0xd5   :  { %107 = vst.msk [vmem:[#allocation2 + $0x8] sm:$0xff] %vm55_vm0, %v105_v41 }
  0xd8   :  { %v108_v42 = vld [vmem:[#allocation2] sm:$0xff] }
  0xd9   :  { %242 = vmatprep.mubr.msk.f32.mxu0 %vm55_vm0, %v108_v42 }
  0xdc   :  { %v109_v43 = vld [vmem:[#allocation2 + $0x8] sm:$0xff] }
  0xdd   :  { %243 = vmatmul.mubr.msk.f32.vlgmr.msra.gmra.mrb[0].mxu0 %vm55_vm0, %v109_v43 }
 0x1b0   :  { %v244_v45 = vpop.f32.mrb[0].mxu0 }
 0x1b1   :  { %v200_v46 = vadd.f32 %v244_v45, %v225_v44  ;;  %v194_v47 = vpop.f32.mrb[1].mxu0 }
 0x1b2   :  { %v195_v48 = vadd.f32 %v225_v44, %v194_v47 }
 0x1b3   :  { %204 = vst [vmem:[#allocation8 + $0x8] sm:$0xff] %v200_v46 }
 0x1b4   :  { %203 = vst [vmem:[#allocation8] sm:$0xff] %v195_v48 }
 0x1b5   :  { %317 = shalt.err (!%p314_p6)
}
 0x1b6   :  { %s318_s4 = scalar_lea.hbm %s436_s5, 256 }
 0x1b7   :  { %p319_p7 = scmp.ne.s32.totalorder %s436_s5, %s318_s4  ;;  %p322_p8 = scmp.lt.u32.totalorder %s318_s4, %s436_s5 }
 0x1b9   :  { %p324_p9 = pnand %p322_p8, %p319_p7 }
 0x1bb   :  { %327 = shalt.err (!%p324_p9)
}
 0x1bc   :  { %216 = dma.vmem_to_hbm [thread:$0]  %s211_s22, 256, %s436_s5, [#allocation5], %s335_s28, %s335_s28, %s336_s29  }
 0x1bd   :  { %332 = dma.done.wait [#allocation5], 256  }
 0x1be   :  { %333 = vsyncadd [#allocation5], 4294967040 }
 0x1bf   :  { %220 = vsyncpa [#allocation4], 1 }
 0x1c0   :  { %221 = vsyncpa [#allocation7], 1 }
 0x1c1   :  { %222 = vsyncpa [#allocation5], 1 }

</bundles_post_ra>
